<compile_context>
chip_gen: v7x
topology: tpu7x:2x2x1
jax: 0.10.0
libtpu: 0.0.40
codegen_flags: <defaults>
</compile_context>

<pallas_src>
import math

import jax
import jax.numpy as jnp
from jax import lax
from jax.experimental import pallas as pl
from jax.experimental.pallas import tpu as pltpu

_LANE = 128  # TPU vreg lane width

# Conservative per-step working-set budget: double-buffered embedding tile +
# double-buffered output tile must fit the smallest default scoped VMEM of the
# three targets (v5e: 16 MiB).  Weight/bias are a few KiB and ignored here.
_VMEM_BUDGET_BYTES = 12 * 1024 * 1024


def _tensor_network_kernel(w_ref, x_ref, b_ref, o_ref):
    # (T, F) @ (F, tn) on the MXU, f32 accumulation, full-precision f32 inputs.
    acc = jnp.dot(
        w_ref[...], x_ref[...],
        preferred_element_type=jnp.float32,
        precision=lax.Precision.HIGHEST,
    )
    acc = acc + b_ref[...]                      # (T, tn) + (T, 1) broadcast (VPU)
    o_ref[...] = jnp.maximum(acc, 0.0).astype(o_ref.dtype)


def _num_tensorcores():
    """Best-effort TensorCore-per-device count (2 on v7x megacore, else 1)."""
    try:
        return max(1, int(getattr(jax.devices()[0], "num_cores", 1)))
    except Exception:  # pragma: no cover - defensive
        return 1


def _pick_column_tile(n, t, f, num_cores):
    """Largest lane-dense column tile that fits the VMEM budget.

    Returns a tile width that is either == n (single full block, no masking)
    or a multiple of 128 (partial last block handled by masked stores).
    """
    bytes_per_col = 2 * (f + t) * 4            # double-buffered X + out, f32
    max_tn = max(_LANE, (_VMEM_BUDGET_BYTES // bytes_per_col) // _LANE * _LANE)

    if n <= max_tn:
        tn = n                                  # one block, width == full dim
        if num_cores > 1 and n >= num_cores * _LANE:
            # v7x: keep >= 1 tile per TensorCore so "parallel" buys real HW.
            tn = pl.cdiv(pl.cdiv(n, num_cores), _LANE) * _LANE
        return tn
    return max_tn


def tensor_network_forward(weight, bias, embedding_1, *, column_tile=None):
    """relu(weight @ embedding_1 + bias) with lane-dense column tiling."""
    T, F = weight.shape
    F2, N = embedding_1.shape
    assert F == F2, f"contraction mismatch: {F} vs {F2}"
    assert bias.shape == (T, 1)

    if column_tile is None:
        tn = _pick_column_tile(N, T, F, _num_tensorcores())
    else:
        tn = column_tile
        assert tn == N or tn % _LANE == 0, "override tile must be N or a multiple of 128"

    grid = (pl.cdiv(N, tn),)

    cost = pl.CostEstimate(
        flops=2 * T * F * N,
        transcendentals=0,
        bytes_accessed=4 * (T * F + F * N + T * N + T),
    )

    return pl.pallas_call(
        _tensor_network_kernel,
        out_shape=jax.ShapeDtypeStruct((T, N), jnp.float32),
        grid_spec=pltpu.PrefetchScalarGridSpec(
            num_scalar_prefetch=0,
            grid=grid,
            in_specs=[
                # Weight/bias: constant block index -> fetched once, VMEM-resident.
                pl.BlockSpec((T, F), lambda j: (0, 0)),
                # Embedding: one lane-dense (F, tn) column tile per grid step.
                pl.BlockSpec((F, tn), lambda j: (0, j)),
                pl.BlockSpec((T, 1), lambda j: (0, 0)),
            ],
            out_specs=pl.BlockSpec((T, tn), lambda j: (0, j)),
        ),
        compiler_params=pltpu.CompilerParams(
            dimension_semantics=("parallel",),
        ),
        cost_estimate=cost,
    )(weight, embedding_1, bias)


def xavier_uniform(key, shape, dtype=jnp.float32):
    """Deterministic equivalent of torch.nn.init.xavier_uniform_ (gain=1)."""
    fan_out, fan_in = shape[0], shape[1]
    bound = math.sqrt(6.0 / (fan_in + fan_out))
    return jax.random.uniform(key, shape, dtype, minval=-bound, maxval=bound)


if __name__ == "__main__":
    # Module-consistent shapes: args.tensor_neurons = 16, args.filters_3 = 32.
    tensor_neurons = 16
    filters_3 = 32

    key = jax.random.PRNGKey(0)
    k_w, k_b, k_x1, k_x2, k_x3 = jax.random.split(key, 5)

    weight_matrix_block = xavier_uniform(k_w, (tensor_neurons, filters_3))
    bias = xavier_uniform(k_b, (tensor_neurons, 1))

    ok = True

    # Case 1: batched column count (1024 columns) — single (or per-core-split)
    # full block, no padding, no masking.
    n_cols = 1024
    embedding_1 = jax.random.normal(k_x1, (filters_3, n_cols), dtype=jnp.float32)
    scores = tensor_network_forward(weight_matrix_block, bias, embedding_1)
    scores = jax.block_until_ready(scores)
    ref = jnp.maximum(weight_matrix_block @ embedding_1 + bias, 0.0)
    ok &= scores.shape == (tensor_neurons, n_cols)
    ok &= bool(jnp.allclose(scores, ref, atol=1e-5, rtol=1e-5))

    # Case 2: ragged column count, still a single full block (block width == N,
    # which is legal for any N) — no wrapper pad/slice anymore.
    n_ragged = 200
    embedding_2 = jax.random.normal(k_x2, (filters_3, n_ragged), dtype=jnp.float32)
    scores2 = tensor_network_forward(weight_matrix_block, bias, embedding_2)
    scores2 = jax.block_until_ready(scores2)
    ref2 = jnp.maximum(weight_matrix_block @ embedding_2 + bias, 0.0)
    ok &= scores2.shape == (tensor_neurons, n_ragged)
    ok &= bool(jnp.allclose(scores2, ref2, atol=1e-5, rtol=1e-5))

    # Case 3: force the multi-tile path with a partial final block (exercises the
    # masked-store boundary handling used for very large N) at a small size.
    n_multi = 1000
    embedding_3 = jax.random.normal(k_x3, (filters_3, n_multi), dtype=jnp.float32)
    scores3 = tensor_network_forward(
        weight_matrix_block, bias, embedding_3, column_tile=384)
    scores3 = jax.block_until_ready(scores3)
    ref3 = jnp.maximum(weight_matrix_block @ embedding_3 + bias, 0.0)
    ok &= scores3.shape == (tensor_neurons, n_multi)
    ok &= bool(jnp.allclose(scores3, ref3, atol=1e-5, rtol=1e-5))

    assert ok, "Pallas kernel output does not match JAX reference"
    print("KERNEL_OK")
</pallas_src>

<mosaic_0001>
module attributes {stable_mosaic.version = 11 : i64} {
  func.func @_tensor_network_kernel(%arg0: i32, %arg1: memref<16x32xf32, #tpu.memory_space<vmem>>, %arg2: memref<32x1024xf32, #tpu.memory_space<vmem>>, %arg3: memref<16x1xf32, #tpu.memory_space<vmem>>, %arg4: memref<16x1024xf32, #tpu.memory_space<vmem>>) attributes {dimension_semantics = [#tpu.dimension_semantics<parallel>], iteration_bounds = array<i64: 1>, scalar_prefetch = 0 : i64, scratch_operands = 0 : i64, tpu.core_type = #tpu.core_type<tc>, window_params = [{pipeline_mode = #tpu.pipeline_mode<synchronous>, transform_indices = @transform_0, window_bounds = array<i64: 16, 32>}, {transform_indices = @transform_1, window_bounds = array<i64: 32, 1024>}, {pipeline_mode = #tpu.pipeline_mode<synchronous>, transform_indices = @transform_2, window_bounds = array<i64: 16, 1>}, {transform_indices = @transform_3, window_bounds = array<i64: 16, 1024>}]} {
    %c0 = arith.constant 0 : index
    %c0_0 = arith.constant 0 : index
    %0 = vector.load %arg1[%c0, %c0_0] : memref<16x32xf32, #tpu.memory_space<vmem>>, vector<16x32xf32>
    %c0_1 = arith.constant 0 : index
    %c0_2 = arith.constant 0 : index
    %1 = vector.load %arg2[%c0_1, %c0_2] : memref<32x1024xf32, #tpu.memory_space<vmem>>, vector<32x1024xf32>
    %cst = arith.constant dense<0.000000e+00> : vector<16x1024xf32>
    %2 = tpu.matmul %0, %1, %cst {dimension_numbers = #tpu.dot_dimension_numbers<[1], [0], [0], [1], [0, 0, 1, 1], [], []>, precision = #tpu.contract_precision<fp32>} : vector<16x32xf32>, vector<32x1024xf32>, vector<16x1024xf32> -> vector<16x1024xf32>
    %c0_3 = arith.constant 0 : index
    %c0_4 = arith.constant 0 : index
    %3 = vector.load %arg3[%c0_3, %c0_4] : memref<16x1xf32, #tpu.memory_space<vmem>>, vector<16x1xf32>
    %4 = vector.broadcast %3 : vector<16x1xf32> to vector<16x1024xf32>
    %5 = arith.addf %2, %4 : vector<16x1024xf32>
    %cst_5 = arith.constant 0.000000e+00 : f32
    %6 = vector.broadcast %cst_5 : f32 to vector<16x1024xf32>
    %7 = arith.maximumf %5, %6 : vector<16x1024xf32>
    %c0_6 = arith.constant 0 : index
    %c0_7 = arith.constant 0 : index
    %8 = vector.load %arg4[%c0_6, %c0_7] : memref<16x1024xf32, #tpu.memory_space<vmem>>, vector<16x1024xf32>
    tpu.vector_store %arg4[%c0_6, %c0_7], %7 {strides = array<i32>} : memref<16x1024xf32, #tpu.memory_space<vmem>>, vector<16x1024xf32>,
    return
  }
  func.func @transform_0(%arg0: i32) -> (i32, i32) {
    %c0_i32 = arith.constant 0 : i32
    %c0_i32_0 = arith.constant 0 : i32
    %c0_i32_1 = arith.constant 0 : i32
    return %c0_i32, %c0_i32_0 : i32, i32
  }
  func.func @transform_1(%arg0: i32) -> (i32, i32) {
    %c0_i32 = arith.constant 0 : i32
    %c0_i32_0 = arith.constant 0 : i32
    return %c0_i32, %arg0 : i32, i32
  }
  func.func @transform_2(%arg0: i32) -> (i32, i32) {
    %c0_i32 = arith.constant 0 : i32
    %c0_i32_0 = arith.constant 0 : i32
    %c0_i32_1 = arith.constant 0 : i32
    return %c0_i32, %c0_i32_0 : i32, i32
  }
  func.func @transform_3(%arg0: i32) -> (i32, i32) {
    %c0_i32 = arith.constant 0 : i32
    %c0_i32_0 = arith.constant 0 : i32
    return %c0_i32, %arg0 : i32, i32
  }
}

</mosaic_0001>

<bundles_post_ra>
// kernel: tpu_custom_call.1
= control target key start
LH: loop header
LB: loop body
LE: loop exit
PB: predicated region body
PF: predicated region fallthrough
CT: control target
= control target key end

     0   :  { %8 = vsyncpa [#allocation3], 0  ;;  %s3416_s0 = inlined_call_operand.vmem [shape: f32[16,32], index: 0, kind: input, shape index: {}]   ;;  %s3417_s1 = inlined_call_operand.hbm [shape: f32[32,1024], index: 1, kind: input, shape index: {}]   ;;  %s3418_s2 = inlined_call_operand.vmem [shape: f32[16,1], index: 2, kind: input, shape index: {}]   ;;  %s3419_s3 = inlined_call_operand.hbm [shape: f32[16,1024], index: 3, kind: output, shape index: {}]  }
   0x1   :  { %9 = vsyncpa [#allocation4], 0  ;;  %s2842_s12 = smov [#allocation2]   ;;  %s2794_s16 = scalar_lea.hbm %s3417_s1, 4096 }
   0x2   :  { %s17_s13 = sshll.u32 %s2842_s12, 4  ;;  %p2795_p0 = scmp.ne.s32.totalorder %s3417_s1, %s2794_s16  ;;  %s18_s13 = int_to_ptr.vmem [resolvable:$true] %s17_s13 }
   0x3   :  { %p2798_p1 = scmp.lt.u32.totalorder %s2794_s16, %s3417_s1 }
   0x5   :  { %p2800_p2 = pnand %p2798_p1, %p2795_p0 }
   0x7   :  { %2803 = shalt.err (!%p2800_p2)
}
   0x8   :  { %s2804_s21 = scalar_lea.vmem %s18_s13, 4096  ;;  %p2809_p4 = scmp.lt.s32.totalorder %s18_s13, %s18_s13 }
   0x9   :  { %p2805_p3 = scmp.ne.s32.totalorder %s18_s13, %s2804_s21  ;;  %p2810_p5 = scmp.lt.s32.totalorder %s2804_s21, %s2804_s21 }
   0xb   :  { %p2811_p6 = por %p2810_p5, %p2809_p4 }
   0xd   :  { %p2812_p7 = pnand %p2811_p6, %p2805_p3 }
   0xf   :  { %2815 = shalt.err (!%p2812_p7)
}
  0x10   :  { %s2843_s22 = smov 1024   ;;  %s2844_s23 = smov 64  }
  0x11   :  { %23 = dma.hbm_to_vmem [thread:$0]  %s3417_s1, 4096, %s18_s13, [#allocation3], %s2843_s22, %s2843_s22, %s2844_s23  }
  0x12   :  { %2838 = dma.done.wait [#allocation3], 4096  }
  0x13   :  { %2839 = vsyncadd [#allocation3], 4294963200  ;;  %v2845_v0 = vmov 0.0   ;;  %v2846_v1 = vmov 0   ;;  %v32_v2 = vld [vmem:[#allocation2 + $0x8] sm:$0xff]  ;;  %v34_v4 = vld [vmem:[#allocation2 + $0x18] sm:$0xff] }
  0x14   :  { %154 = vmatprep.mubr.f32.mxu0 %v2845_v0  ;;  %746 = vmatprep.mubr.f32.mxu1 %v2845_v0  ;;  %v40_v3 = vld [vmem:[#allocation2 + $0x48] sm:$0xff]  ;;  %vm75_vm0 = vcmask 261120   ;;  %v82_v5 = vand.u32 4294901760, %v32_v2  ;;  %v42_v7 = vld [vmem:[#allocation2 + $0x58] sm:$0xff]  ;;  %v674_v8 = vand.u32 4294901760, %v34_v4  ;;  %v31_v9 = vld [vmem:[#allocation2] sm:$0xff] }
  0x15   :  { %2793 = vset.pattern.permute.xlu0 %v2846_v1  ;;  %v86_v6 = vand.u32 4294901760, %v40_v3  ;;  %v39_v10 = vld [vmem:[#allocation2 + $0x40] sm:$0xff]  ;;  %v678_v11 = vand.u32 4294901760, %v42_v7  ;;  %v84_v12 = vand.u32 4294901760, %v31_v9  ;;  %v33_v14 = vld [vmem:[#allocation2 + $0x10] sm:$0xff]  ;;  %v48_v16 = vld [vmem:[#allocation2 + $0x88] sm:$0xff] }
  0x16   :  { %v88_v13 = vand.u32 4294901760, %v39_v10  ;;  %v41_v15 = vld [vmem:[#allocation2 + $0x50] sm:$0xff]  ;;  %v2887_v18 = vsub.f32 %v32_v2, %v82_v5  ;;  %v2891_v20 = vsub.f32 %v34_v4, %v674_v8  ;;  %v56_v21 = vld [vmem:[#allocation2 + $0xc8] sm:$0xff]  ;;  %v50_v22 = vld [vmem:[#allocation2 + $0x98] sm:$0xff]  ;;  %v676_v30 = vand.u32 4294901760, %v33_v14 }
  0x17   :  { %v2885_v17 = vpack.c.bf16 %v86_v6, %v82_v5  ;;  %v2889_v19 = vsub.f32 %v40_v3, %v86_v6  ;;  %v58_v23 = vld [vmem:[#allocation2 + $0xd8] sm:$0xff]  ;;  %v2893_v24 = vpack.c.bf16 %v678_v11, %v674_v8  ;;  %v2895_v25 = vsub.f32 %v42_v7, %v678_v11  ;;  %v47_v28 = vld [vmem:[#allocation2 + $0x80] sm:$0xff]  ;;  %v49_v38 = vld [vmem:[#allocation2 + $0x90] sm:$0xff] }
  0x18   :  { %v2897_v26 = vpack.c.bf16 %v88_v13, %v84_v12  ;;  %v2899_v27 = vsub.f32 %v31_v9, %v84_v12  ;;  %v2902_v29 = vsub.f32 %v39_v10, %v88_v13  ;;  %v680_v31 = vand.u32 4294901760, %v41_v15  ;;  %v55_v36 = vld [vmem:[#allocation2 + $0xc0] sm:$0xff]  ;;  %v57_v43 = vld [vmem:[#allocation2 + $0xd0] sm:$0xff]  ;;  %v64_v11 = vld [vmem:[%s3418_s2 + $0x8] sm:$0xff] }
  0x19   :  { %2500 = vmatprep.subr.bf16.mxu0 %v2885_v17  ;;  %v90_v32 = vand.u32 4294901760, %v48_v16  ;;  %2548 = vmatprep.subr.bf16.mxu1 %v2893_v24  ;;  %v94_v33 = vand.u32 4294901760, %v56_v21  ;;  %v682_v34 = vand.u32 4294901760, %v50_v22  ;;  %v686_v35 = vand.u32 4294901760, %v58_v23  ;;  %v29_v44 = vld [vmem:[%s3416_s0] sm:$0xff] }
  0x1a   :  { %2502 = vmatpush1.bf16.msra.mxu0 %v2897_v26  ;;  %v92_v37 = vand.u32 4294901760, %v47_v28  ;;  %v2906_v39 = vpack.c.bf16 %v680_v31, %v676_v30  ;;  %v2908_v40 = vsub.f32 %v33_v14, %v676_v30  ;;  %v2910_v41 = vsub.f32 %v41_v15, %v680_v31  ;;  %v63_v2 = vld [vmem:[%s3418_s2] sm:$0xff] }
  0x1b   :  { %v2912_v42 = vsub.f32 %v48_v16, %v90_v32  ;;  %v2917_v45 = vpack.c.bf16 %v94_v33, %v90_v32  ;;  %v2919_v46 = vsub.f32 %v56_v21, %v94_v33  ;;  %v2921_v47 = vpack.c.bf16 %v686_v35, %v682_v34  ;;  %67 = vperm.xlu0 %2793, %v63_v2   ;;  %v30_v16 = vld [vmem:[%s3416_s0 + $0x8] sm:$0xff]  ;;  %s2847_s0 = smov [#allocation5]  }
  0x1c   :  { %v2923_v48 = vsub.f32 %v50_v22, %v682_v34  ;;  %2550 = vmatpush1.bf16.msra.mxu1 %v2906_v39  ;;  %v2926_v49 = vsub.f32 %v58_v23, %v686_v35  ;;  %v96_v50 = vand.u32 4294901760, %v55_v36  ;;  %v2928_v51 = vsub.f32 %v47_v28, %v92_v37  ;;  %s2487_s2 = sshll.u32 %s2847_s0, 4  ;;  %s2488_s2 = int_to_ptr.vmem [resolvable:$true] %s2487_s2 }
  0x1d   :  { %v684_v52 = vand.u32 4294901760, %v49_v38  ;;  %2504 = vmatprep.subr.bf16.mxu0 %v2917_v45  ;;  %2552 = vmatprep.subr.bf16.mxu1 %v2921_v47  ;;  %v688_v53 = vand.u32 4294901760, %v57_v43  ;;  %v77_v54 = vsel %vm75_vm0, %v29_v44, 0  ;;  %v179_v55 = vand.u32 4294901760, %v2887_v18  ;;  %s2816_s6 = scalar_lea.vmem %s2488_s2, 2048  ;;  %p2821_p9 = scmp.lt.s32.totalorder %s2488_s2, %s2488_s2 }
  0x1e   :  { %v191_v56 = vand.u32 4294901760, %v2889_v19  ;;  %v2935_v57 = vpack.c.bf16 %v96_v50, %v92_v37  ;;  %v2937_v58 = vsub.f32 %v55_v36, %v96_v50  ;;  %v2941_v60 = vand.u32 4294901760, %v77_v54  ;;  %p2817_p8 = scmp.ne.s32.totalorder %s2488_s2, %s2816_s6  ;;  %p2822_p10 = scmp.lt.s32.totalorder %s2816_s6, %s2816_s6 }
  0x1f   :  { %v2939_v59 = vsub.f32 %v49_v38, %v684_v52  ;;  %v2943_v61 = vpack.c.bf16 %v688_v53, %v684_v52  ;;  %v2945_v62 = vsub.f32 %v57_v43, %v688_v53  ;;  %v180_v63 = vsub.f32 %v2887_v18, %v179_v55  ;;  %72 = vperm.xlu0 %2793, %v64_v11  }
  0x20   :  { %v192_v1 = vsub.f32 %v2889_v19, %v191_v56  ;;  %2506 = vmatpush1.bf16.msra.mxu0 %v2935_v57  ;;  %v2958_v3 = vsub.f32 %v77_v54, %v2941_v60  ;;  %v771_v4 = vand.u32 4294901760, %v2891_v20  ;;  %v783_v5 = vand.u32 4294901760, %v2895_v25  ;;  %p2823_p11 = por %p2822_p10, %p2821_p9 }
  0x21   :  { %v185_v6 = vand.u32 4294901760, %v2899_v27  ;;  %2554 = vmatpush1.bf16.msra.mxu1 %v2943_v61  ;;  %v181_v7 = vand.u32 4294901760, %v180_v63  ;;  %v197_v9 = vand.u32 4294901760, %v2902_v29  ;;  %v777_v10 = vand.u32 4294901760, %v2908_v40 }
  0x22   :  { %v193_v8 = vand.u32 4294901760, %v192_v1  ;;  %v2970_v12 = vand.u32 4294901760, %v2958_v3  ;;  %v772_v13 = vsub.f32 %v2891_v20, %v771_v4  ;;  %v784_v14 = vsub.f32 %v2895_v25, %v783_v5  ;;  %p2824_p12 = pnand %p2823_p11, %p2817_p8 }
  0x23   :  { %v186_v15 = vsub.f32 %v2899_v27, %v185_v6  ;;  %v198_v22 = vsub.f32 %v2902_v29, %v197_v9  ;;  %v778_v23 = vsub.f32 %v2908_v40, %v777_v10  ;;  %v789_v28 = vand.u32 4294901760, %v2910_v41 }
  0x24   :  { %v2507_v21 = vpack.c.bf16 %v193_v8, %v181_v7  ;;  %v158_v30 = vsub.f32 %v2958_v3, %v2970_v12  ;;  %v773_v31 = vand.u32 4294901760, %v772_v13  ;;  %v785_v32 = vand.u32 4294901760, %v784_v14 }
  0x25   :  { %v187_v33 = vand.u32 4294901760, %v186_v15  ;;  %v199_v34 = vand.u32 4294901760, %v198_v22  ;;  %v779_v35 = vand.u32 4294901760, %v778_v23  ;;  %v790_v36 = vsub.f32 %v2910_v41, %v789_v28 }
  0x26   :  { %2508 = vmatprep.subr.bf16.mxu0 %v2507_v21  ;;  %v80_v37 = vsel %vm75_vm0, %v30_v16, 0  ;;  %v2997_v38 = vand.u32 4294901760, %v158_v30  ;;  %v2555_v43 = vpack.c.bf16 %v785_v32, %v773_v31  ;;  %v203_v50 = vand.u32 4294901760, %v2912_v42 }
  0x27   :  { %v2999_v44 = vand.u32 4294901760, %v80_v37  ;;  %v2509_v52 = vpack.c.bf16 %v199_v34, %v187_v33  ;;  %v791_v53 = vand.u32 4294901760, %v790_v36  ;;  %v215_v54 = vand.u32 4294901760, %v2919_v46 }
  0x28   :  { %v795_v63 = vand.u32 4294901760, %v2923_v48  ;;  %160 = vmatmul.mubr.f32.vlgmr.msra.gmra.mrb[0].mxu0 %v2997_v38  ;;  %752 = vmatmul.mubr.f32.vlgmr.msra.gmra.mrb[0].mxu1 %v2997_v38  ;;  %v204_v2 = vsub.f32 %v2912_v42, %v203_v50  ;;  %v807_v7 = vand.u32 4294901760, %v2926_v49  ;;  %v209_v8 = vand.u32 4294901760, %v2928_v51 }
  0x29   :  { %v3007_v1 = vsub.f32 %v80_v37, %v2999_v44  ;;  %2556 = vmatprep.subr.bf16.mxu1 %v2555_v43  ;;  %2510 = vmatpush1.bf16.msra.mxu0 %v2509_v52  ;;  %v2557_v11 = vpack.c.bf16 %v791_v53, %v779_v35  ;;  %v216_v13 = vsub.f32 %v2919_v46, %v215_v54  ;;  %v3420_v15 = vand.u32 4294901760, %v2937_v58 }
  0x2a   :  { %v796_v14 = vsub.f32 %v2923_v48, %v795_v63  ;;  %165 = vmatprep.mubr.f32.mxu0 %v2845_v0  ;;  %757 = vmatprep.mubr.f32.mxu1 %v2845_v0  ;;  %v205_v21 = vand.u32 4294901760, %v204_v2  ;;  %v808_v22 = vsub.f32 %v2926_v49, %v807_v7  ;;  %v210_v23 = vsub.f32 %v2928_v51, %v209_v8 }
  0x2b   :  { %v3024_v16 = vand.u32 4294901760, %v3007_v1  ;;  %2558 = vmatpush1.bf16.msra.mxu1 %v2557_v11  ;;  %v217_v30 = vand.u32 4294901760, %v216_v13  ;;  %v222_v32 = vsub.f32 %v2937_v58, %v3420_v15  ;;  %v801_v33 = vand.u32 4294901760, %v2939_v59 }
  0x2c   :  { %v797_v31 = vand.u32 4294901760, %v796_v14  ;;  %v809_v35 = vand.u32 4294901760, %v808_v22  ;;  %v211_v36 = vand.u32 4294901760, %v210_v23  ;;  %v813_v37 = vand.u32 4294901760, %v2945_v62 }
  0x2d   :  { %v169_v34 = vsub.f32 %v3007_v1, %v3024_v16  ;;  %v2511_v43 = vpack.c.bf16 %v217_v30, %v205_v21  ;;  %v223_v52 = vand.u32 4294901760, %v222_v32  ;;  %v802_v53 = vsub.f32 %v2939_v59, %v801_v33 }
  0x2e   :  { %v2559_v11 = vpack.c.bf16 %v809_v35, %v797_v31  ;;  %v814_v13 = vsub.f32 %v2945_v62, %v813_v37  ;;  %v2515_v22 = vpack.c.bf16 %v2889_v19, %v2887_v18  ;;  %v2563_v23 = vpack.c.bf16 %v2895_v25, %v2891_v20  ;;  %v43_v19 = vld [vmem:[#allocation2 + $0x60] sm:$0xff] }
  0x2f   :  { %v3042_v2 = vand.u32 4294901760, %v169_v34  ;;  %2512 = vmatprep.subr.bf16.mxu0 %v2511_v43  ;;  %v2513_v14 = vpack.c.bf16 %v223_v52, %v211_v36  ;;  %v803_v15 = vand.u32 4294901760, %v802_v53  ;;  %v2517_v30 = vpack.c.bf16 %v2902_v29, %v2899_v27  ;;  %v36_v43 = vld [vmem:[#allocation2 + $0x28] sm:$0xff] }
  0x30   :  { %v815_v21 = vand.u32 4294901760, %v814_v13  ;;  %2560 = vmatprep.subr.bf16.mxu1 %v2559_v11  ;;  %v2519_v32 = vpack.c.bf16 %v2919_v46, %v2912_v42  ;;  %v2565_v34 = vpack.c.bf16 %v2910_v41, %v2908_v40  ;;  %v2567_v35 = vpack.c.bf16 %v2926_v49, %v2923_v48  ;;  %v44_v52 = vld [vmem:[#allocation2 + $0x68] sm:$0xff]  ;;  %v38_v11 = vld [vmem:[#allocation2 + $0x38] sm:$0xff] }
  0x31   :  { %171 = vmatmul.mubr.f32.gmra.mrb[2].mxu0 %v3042_v2  ;;  %763 = vmatmul.mubr.f32.gmra.mrb[2].mxu1 %v3042_v2  ;;  %v2569_v36 = vpack.c.bf16 %v2945_v62, %v2939_v59  ;;  %v2531_v53 = vpack.c.bf16 %v191_v56, %v179_v55  ;;  %v46_v13 = vld [vmem:[#allocation2 + $0x78] sm:$0xff]  ;;  %v1270_v18 = vand.u32 4294901760, %v44_v52  ;;  %v2533_v55 = vpack.c.bf16 %v197_v9, %v185_v6  ;;  %v37_v56 = vld [vmem:[#allocation2 + $0x30] sm:$0xff]  ;;  %v60_v29 = vld [vmem:[#allocation2 + $0xe8] sm:$0xff] }
  0x32   :  { %2514 = vmatpush1.bf16.msra.mxu0 %v2513_v14  ;;  %v2561_v31 = vpack.c.bf16 %v815_v21, %v803_v15  ;;  %281 = vmatprep.mubr.f32.mxu0 %v2845_v0  ;;  %v2521_v15 = vpack.c.bf16 %v2937_v58, %v2928_v51  ;;  %v2579_v14 = vpack.c.bf16 %v783_v5, %v771_v4  ;;  %v35_v21 = vld [vmem:[#allocation2 + $0x20] sm:$0xff]  ;;  %v1858_v4 = vand.u32 4294901760, %v38_v11  ;;  %v52_v5 = vld [vmem:[#allocation2 + $0xa8] sm:$0xff] }
  0x33   :  { %873 = vmatprep.mubr.f32.mxu1 %v2845_v0  ;;  %2516 = vmatprep.subr.bf16.mxu0 %v2515_v22  ;;  %v1266_v22 = vand.u32 4294901760, %v36_v43  ;;  %v2581_v20 = vpack.c.bf16 %v789_v28, %v777_v10  ;;  %v2535_v25 = vpack.c.bf16 %v215_v54, %v203_v50  ;;  %v1862_v27 = vand.u32 4294901760, %v46_v13  ;;  %v54_v28 = vld [vmem:[#allocation2 + $0xb8] sm:$0xff]  ;;  %v59_v59 = vld [vmem:[#allocation2 + $0xe0] sm:$0xff] }
  0x34   :  { %2562 = vmatpush1.bf16.msra.mxu1 %v2561_v31  ;;  %v2583_v40 = vpack.c.bf16 %v807_v7, %v795_v63  ;;  %v3430_v41 = vand.u32 4294901760, %v2937_v58  ;;  %v1268_v46 = vand.u32 4294901760, %v35_v21  ;;  %v1272_v6 = vand.u32 4294901760, %v43_v19  ;;  %v62_v50 = vld [vmem:[#allocation2 + $0xf8] sm:$0xff]  ;;  %v51_v7 = vld [vmem:[#allocation2 + $0xa0] sm:$0xff] }
  0x35   :  { %283 = vmatmul.mubr.f32.vlgmr.msra.gmra.mrb[0].mxu0 %v2941_v60  ;;  %2564 = vmatprep.subr.bf16.mxu1 %v2563_v23  ;;  %v45_v23 = vld [vmem:[#allocation2 + $0x70] sm:$0xff]  ;;  %v2585_v9 = vpack.c.bf16 %v813_v37, %v801_v33  ;;  %v3124_v10 = vpack.c.bf16 %v1270_v18, %v1266_v22  ;;  %v1860_v48 = vand.u32 4294901760, %v37_v56  ;;  %v3127_v51 = vsub.f32 %v36_v43, %v1266_v22 }
  0x36   :  { %2518 = vmatpush1.bf16.msra.mxu0 %v2517_v30  ;;  %288 = vmatprep.mubr.f32.mxu0 %v2845_v0  ;;  %v2537_v42 = vpack.c.bf16 %v3430_v41, %v209_v8  ;;  %v1864_v49 = vand.u32 4294901760, %v45_v23  ;;  %v3129_v58 = vsub.f32 %v44_v52, %v1270_v18  ;;  %v1274_v54 = vand.u32 4294901760, %v52_v5  ;;  %v3148_v43 = vld [vmem:[#allocation2 + $0xb0] sm:$0xff] }
  0x37   :  { %2520 = vmatprep.subr.bf16.mxu0 %v2519_v32  ;;  %875 = vmatmul.mubr.f32.vlgmr.msra.gmra.mrb[0].mxu1 %v2941_v60  ;;  %v1278_v63 = vand.u32 4294901760, %v60_v29  ;;  %v3132_v62 = vpack.c.bf16 %v1862_v27, %v1858_v4  ;;  %v3134_v8 = vsub.f32 %v38_v11, %v1858_v4  ;;  %v3136_v33 = vsub.f32 %v46_v13, %v1862_v27  ;;  %v3150_v52 = vld [vmem:[#allocation2 + $0xf0] sm:$0xff] }
  0x38   :  { %2566 = vmatpush1.bf16.msra.mxu1 %v2565_v34  ;;  %880 = vmatprep.mubr.f32.mxu1 %v2845_v0  ;;  %v3139_v37 = vpack.c.bf16 %v1272_v6, %v1268_v46  ;;  %v3141_v30 = vsub.f32 %v35_v21, %v1268_v46  ;;  %v1866_v31 = vand.u32 4294901760, %v54_v28  ;;  %v1870_v32 = vand.u32 4294901760, %v62_v50 }
  0x39   :  { %290 = vmatmul.mubr.f32.gmra.mrb[2].mxu0 %v2999_v44  ;;  %2568 = vmatprep.subr.bf16.mxu1 %v2567_v35  ;;  %v3144_v34 = vsub.f32 %v43_v19, %v1272_v6  ;;  %v3146_v35 = vpack.c.bf16 %v1864_v49, %v1860_v48  ;;  %v3155_v11 = vsub.f32 %v45_v23, %v1864_v49  ;;  %v1363_v18 = vand.u32 4294901760, %v3127_v51 }
  0x3a   :  { %2522 = vmatpush1.bf16.msra.mxu0 %v2521_v15  ;;  %376 = vmatprep.mubr.f32.mxu0 %v2845_v0  ;;  %v1276_v15 = vand.u32 4294901760, %v51_v7  ;;  %v3157_v13 = vpack.c.bf16 %v1278_v63, %v1274_v54  ;;  %v3163_v22 = vsub.f32 %v60_v29, %v1278_v63  ;;  %v1375_v21 = vand.u32 4294901760, %v3129_v58 }
  0x3b   :  { %882 = vmatmul.mubr.f32.gmra.mrb[2].mxu1 %v2999_v44  ;;  %2524 = vmatprep.subr.bf16.mxu0 %v2885_v17  ;;  %v3168_v19 = vpack.c.bf16 %v1870_v32, %v1866_v31  ;;  %v1872_v23 = vand.u32 4294901760, %v3150_v52  ;;  %v1967_v4 = vand.u32 4294901760, %v3136_v33  ;;  %v1369_v29 = vand.u32 4294901760, %v3141_v30 }
  0x3c   :  { %2570 = vmatpush1.bf16.msra.mxu1 %v2569_v36  ;;  %968 = vmatprep.mubr.f32.mxu1 %v2845_v0  ;;  %v1280_v36 = vand.u32 4294901760, %v59_v59  ;;  %v3184_v27 = vsub.f32 %v51_v7, %v1276_v15 }
  0x3d   :  { %379 = vmatmul.mubr.f32.vlgmr.msra.gmra.mrb[0].mxu0 %v2958_v3  ;;  %2572 = vmatprep.subr.bf16.mxu1 %v2893_v24  ;;  %v3210_v46 = vsub.f32 %v3150_v52, %v1872_v23 }
  0x3e   :  { %2526 = vmatpush1.bf16.msra.mxu0 %v2897_v26  ;;  %384 = vmatprep.mubr.f32.mxu0 %v2845_v0 }
  0x3f   :  { %971 = vmatmul.mubr.f32.vlgmr.msra.gmra.mrb[0].mxu1 %v2958_v3  ;;  %2528 = vmatprep.subr.bf16.mxu0 %v2917_v45 }
  0x40   :  { %2574 = vmatpush1.bf16.msra.mxu1 %v2906_v39  ;;  %976 = vmatprep.mubr.f32.mxu1 %v2845_v0 }
  0x41   :  { %387 = vmatmul.mubr.f32.gmra.mrb[2].mxu0 %v3007_v1  ;;  %2576 = vmatprep.subr.bf16.mxu1 %v2921_v47 }
  0x42   :  { %2530 = vmatpush1.bf16.msra.mxu0 %v2935_v57  ;;  %465 = vmatprep.mubr.f32.mxu0 %v2845_v0 }
  0x43   :  { %979 = vmatmul.mubr.f32.gmra.mrb[2].mxu1 %v3007_v1  ;;  %2532 = vmatprep.subr.bf16.mxu0 %v2531_v53  ;;  %v3153_v53 = vsub.f32 %v37_v56, %v1860_v48  ;;  %v1868_v56 = vand.u32 4294901760, %v3148_v43  ;;  %v1968_v48 = vsub.f32 %v3136_v33, %v1967_v4 }
  0x44   :  { %2578 = vmatpush1.bf16.msra.mxu1 %v2943_v61  ;;  %1057 = vmatprep.mubr.f32.mxu1 %v2845_v0 }
  0x45   :  { %469 = vmatmul.mubr.f32.vlgmr.msra.gmra.mrb[0].mxu0 %v2970_v12  ;;  %2580 = vmatprep.subr.bf16.mxu1 %v2579_v14  ;;  %v3161_v14 = vsub.f32 %v52_v5, %v1274_v54  ;;  %v3186_v5 = vsub.f32 %v59_v59, %v1280_v36  ;;  %v3422_v6 = vand.u32 4294901760, %v3153_v53  ;;  %v3427_v54 = vand.u32 4294901760, %v3184_v27 }
  0x46   :  { %2534 = vmatpush1.bf16.msra.mxu0 %v2533_v55  ;;  %474 = vmatprep.mubr.f32.mxu0 %v2845_v0  ;;  %v3170_v55 = vsub.f32 %v54_v28, %v1866_v31 }
  0x47   :  { %1061 = vmatmul.mubr.f32.vlgmr.msra.gmra.mrb[0].mxu1 %v2970_v12  ;;  %2536 = vmatprep.subr.bf16.mxu0 %v2535_v25  ;;  %v1955_v25 = vand.u32 4294901760, %v3134_v8  ;;  %v3424_v41 = vand.u32 4294901760, %v3161_v14  ;;  %v3429_v63 = vand.u32 4294901760, %v3186_v5 }
  0x48   :  { %2582 = vmatpush1.bf16.msra.mxu1 %v2581_v20  ;;  %1066 = vmatprep.mubr.f32.mxu1 %v2845_v0  ;;  %v3178_v20 = vpack.c.bf16 %v1280_v36, %v1276_v15  ;;  %v3428_v49 = vand.u32 4294901760, %v3170_v55 }
  0x49   :  { %478 = vmatmul.mubr.f32.gmra.mrb[2].mxu0 %v3024_v16  ;;  %2584 = vmatprep.subr.bf16.mxu1 %v2583_v40  ;;  %v1364_v40 = vsub.f32 %v3127_v51, %v1363_v18  ;;  %v1388_v59 = vsub.f32 %v3161_v14, %v3424_v41 }
  0x4a   :  { %2538 = vmatpush1.bf16.msra.mxu0 %v2537_v42  ;;  %572 = vmatprep.mubr.f32.mxu0 %v2845_v0  ;;  %v3421_v42 = vand.u32 4294901760, %v3163_v22 }
  0x4b   :  { %1070 = vmatmul.mubr.f32.gmra.mrb[2].mxu1 %v3024_v16  ;;  %2540 = vmatprep.subr.bf16.mxu0 %v2885_v17  ;;  %v3176_v17 = vsub.f32 %v62_v50, %v1870_v32  ;;  %v1365_v7 = vand.u32 4294901760, %v1364_v40  ;;  %v1962_v32 = vsub.f32 %v3153_v53, %v3422_v6  ;;  %v1997_v40 = vand.u32 4294901760, %v3210_v46 }
  0x4c   :  { %2586 = vmatpush1.bf16.msra.mxu1 %v2585_v9  ;;  %1164 = vmatprep.mubr.f32.mxu1 %v2845_v0  ;;  %v3423_v9 = vand.u32 4294901760, %v3155_v11  ;;  %v1400_v31 = vsub.f32 %v3163_v22, %v3421_v42  ;;  %v1980_v42 = vsub.f32 %v3170_v55, %v3428_v49 }
  0x4d   :  { %574 = vmatmul.mubr.f32.vlgmr.msra.gmra.mrb[0].mxu0 %v2941_v60  ;;  %2588 = vmatprep.subr.bf16.mxu1 %v2893_v24  ;;  %v3425_v24 = vand.u32 4294901760, %v3144_v34  ;;  %v3426_v28 = vand.u32 4294901760, %v3176_v17 }
  0x4e   :  { %2542 = vmatpush1.bf16.msra.mxu0 %v2897_v26  ;;  %579 = vmatprep.mubr.f32.mxu0 %v2845_v0  ;;  %v1376_v26 = vsub.f32 %v3129_v58, %v1375_v21  ;;  %v1974_v15 = vsub.f32 %v3155_v11, %v3423_v9 }
  0x4f   :  { %1166 = vmatmul.mubr.f32.vlgmr.msra.gmra.mrb[0].mxu1 %v2941_v60  ;;  %2544 = vmatprep.subr.bf16.mxu0 %v2917_v45  ;;  %v3205_v45 = vsub.f32 %v3148_v43, %v1868_v56  ;;  %v1382_v50 = vsub.f32 %v3144_v34, %v3425_v24  ;;  %v1992_v6 = vsub.f32 %v3176_v17, %v3426_v28  ;;  %v1401_v28 = vand.u32 4294901760, %v1400_v31 }
  0x50   :  { %2590 = vmatpush1.bf16.msra.mxu1 %v2906_v39  ;;  %1171 = vmatprep.mubr.f32.mxu1 %v2845_v0  ;;  %v1956_v39 = vsub.f32 %v3134_v8, %v1955_v25  ;;  %v1394_v24 = vsub.f32 %v3184_v27, %v3427_v54  ;;  %v1963_v54 = vand.u32 4294901760, %v1962_v32  ;;  %v1975_v49 = vand.u32 4294901760, %v1974_v15 }
  0x51   :  { %581 = vmatmul.mubr.f32.gmra.mrb[2].mxu0 %v2999_v44  ;;  %2592 = vmatprep.subr.bf16.mxu1 %v2921_v47  ;;  %v1370_v47 = vsub.f32 %v3141_v30, %v1369_v29  ;;  %v1985_v36 = vand.u32 4294901760, %v3205_v45  ;;  %v1383_v41 = vand.u32 4294901760, %v1382_v50  ;;  %v1389_v50 = vand.u32 4294901760, %v1388_v59 }
  0x52   :  { %2546 = vmatpush1.bf16.msra.mxu0 %v2935_v57  ;;  %659 = vmatprep.mubr.f32.mxu0 %v2845_v0  ;;  %v1377_v57 = vand.u32 4294901760, %v1376_v26  ;;  %v1957_v26 = vand.u32 4294901760, %v1956_v39  ;;  %v1406_v39 = vsub.f32 %v3186_v5, %v3429_v63  ;;  %v1998_v43 = vsub.f32 %v3210_v46, %v1997_v40 }
  0x53   :  { %1173 = vmatmul.mubr.f32.gmra.mrb[2].mxu1 %v2999_v44  ;;  %2596 = vmatprep.subr.bf16.mxu0 %v3124_v10  ;;  %v1371_v9 = vand.u32 4294901760, %v1370_v47  ;;  %v1986_v63 = vsub.f32 %v3205_v45, %v1985_v36  ;;  %v2607_v31 = vpack.c.bf16 %v1401_v28, %v1389_v50  ;;  %v2653_v32 = vpack.c.bf16 %v1975_v49, %v1963_v54 }
  0x54   :  { %2594 = vmatpush1.bf16.msra.mxu1 %v2943_v61  ;;  %1251 = vmatprep.mubr.f32.mxu1 %v2845_v0  ;;  %v1969_v61 = vand.u32 4294901760, %v1968_v48  ;;  %v3274_v48 = vpack.c.bf16 %v1872_v23, %v1868_v56  ;;  %v2603_v47 = vpack.c.bf16 %v1377_v57, %v1365_v7  ;;  %v1981_v56 = vand.u32 4294901760, %v1980_v42 }
  0x55   :  { %661 = vmatmul.mubr.f32.vlgmr.msra.gmra.mrb[0].mxu0 %v2941_v60  ;;  %2644 = vmatprep.subr.bf16.mxu1 %v3132_v62  ;;  %v1993_v23 = vand.u32 4294901760, %v1992_v6  ;;  %v2605_v7 = vpack.c.bf16 %v1383_v41, %v1371_v9  ;;  %v1395_v57 = vand.u32 4294901760, %v1394_v24  ;;  %v1407_v59 = vand.u32 4294901760, %v1406_v39 }
  0x56   :  { %2598 = vmatpush1.bf16.msra.mxu0 %v3139_v37  ;;  %666 = vmatprep.mubr.f32.mxu0 %v2845_v0  ;;  %v2651_v52 = vpack.c.bf16 %v1969_v61, %v1957_v26  ;;  %v1987_v15 = vand.u32 4294901760, %v1986_v63  ;;  %v1999_v26 = vand.u32 4294901760, %v1998_v43  ;;  %v2611_v41 = vpack.c.bf16 %v3129_v58, %v3127_v51 }
  0x57   :  { %1253 = vmatmul.mubr.f32.vlgmr.msra.gmra.mrb[0].mxu1 %v2941_v60  ;;  %2600 = vmatprep.subr.bf16.mxu0 %v3157_v13  ;;  %v2655_v42 = vpack.c.bf16 %v1993_v23, %v1981_v56  ;;  %v2609_v24 = vpack.c.bf16 %v1407_v59, %v1395_v57  ;;  %v2659_v9 = vpack.c.bf16 %v3136_v33, %v3134_v8  ;;  %v3431_v51 = vand.u32 4294901760, %v3144_v34 }
  0x58   :  { %2646 = vmatpush1.bf16.msra.mxu1 %v3146_v35  ;;  %1258 = vmatprep.mubr.f32.mxu1 %v2845_v0  ;;  %v2657_v6 = vpack.c.bf16 %v1999_v26, %v1987_v15  ;;  %v2615_v49 = vpack.c.bf16 %v3163_v22, %v3161_v14  ;;  %v2661_v28 = vpack.c.bf16 %v3155_v11, %v3153_v53  ;;  %v3434_v33 = vand.u32 4294901760, %v3153_v53 }
  0x59   :  { %668 = vmatmul.mubr.f32.gmra.mrb[2].mxu0 %v2999_v44  ;;  %2648 = vmatprep.subr.bf16.mxu1 %v3168_v19  ;;  %v2663_v54 = vpack.c.bf16 %v3176_v17, %v3170_v55  ;;  %v2665_v63 = vpack.c.bf16 %v3210_v46, %v3205_v45  ;;  %v2627_v61 = vpack.c.bf16 %v1375_v21, %v1363_v18  ;;  %v3432_v18 = vand.u32 4294901760, %v3161_v14 }
  0x5a   :  { %2602 = vmatpush1.bf16.msra.mxu0 %v3178_v20  ;;  %1338 = vmatprep.mubr.f32.mxu0 %v2845_v0  ;;  %v2629_v58 = vpack.c.bf16 %v3431_v51, %v1369_v29  ;;  %v3433_v21 = vand.u32 4294901760, %v3163_v22  ;;  %v3438_v22 = vand.u32 4294901760, %v3184_v27  ;;  %v2681_v53 = vpack.c.bf16 %v1997_v40, %v1985_v36 }
  0x5b   :  { %1260 = vmatmul.mubr.f32.gmra.mrb[2].mxu1 %v2999_v44  ;;  %2604 = vmatprep.subr.bf16.mxu0 %v2603_v47 }
  0x5c   :  { %2650 = vmatpush1.bf16.msra.mxu1 %v3274_v48  ;;  %1930 = vmatprep.mubr.f32.mxu1 %v2845_v0  ;;  %v2631_v8 = vpack.c.bf16 %v3433_v21, %v3432_v18 }
  0x5d   :  { %1344 = vmatmul.mubr.f32.vlgmr.msra.gmra.mrb[4].mxu0 %v2997_v38  ;;  %2652 = vmatprep.subr.bf16.mxu1 %v2651_v52 }
  0x5e   :  { %2606 = vmatpush1.bf16.msra.mxu0 %v2605_v7  ;;  %1349 = vmatprep.mubr.f32.mxu0 %v2845_v0 }
  0x5f   :  { %1936 = vmatmul.mubr.f32.vlgmr.msra.gmra.mrb[4].mxu1 %v2997_v38  ;;  %2608 = vmatprep.subr.bf16.mxu0 %v2607_v31  ;;  %v2613_v38 = vpack.c.bf16 %v3144_v34, %v3141_v30  ;;  %v3437_v34 = vand.u32 4294901760, %v3176_v17 }
  0x60   :  { %2654 = vmatpush1.bf16.msra.mxu1 %v2653_v32  ;;  %1941 = vmatprep.mubr.f32.mxu1 %v2845_v0 }
  0x61   :  { %1355 = vmatmul.mubr.f32.gmra.mrb[6].mxu0 %v3042_v2  ;;  %2656 = vmatprep.subr.bf16.mxu1 %v2655_v42 }
  0x62   :  { %2610 = vmatpush1.bf16.msra.mxu0 %v2609_v24  ;;  %1465 = vmatprep.mubr.f32.mxu0 %v2845_v0 }
  0x63   :  { %1947 = vmatmul.mubr.f32.gmra.mrb[6].mxu1 %v3042_v2  ;;  %2612 = vmatprep.subr.bf16.mxu0 %v2611_v41  ;;  %v2617_v2 = vpack.c.bf16 %v3186_v5, %v3184_v27 }
  0x64   :  { %2658 = vmatpush1.bf16.msra.mxu1 %v2657_v6  ;;  %2057 = vmatprep.mubr.f32.mxu1 %v2845_v0 }
  0x65   :  { %1467 = vmatmul.mubr.f32.vlgmr.msra.gmra.mrb[4].mxu0 %v2941_v60  ;;  %2660 = vmatprep.subr.bf16.mxu1 %v2659_v9 }
  0x66   :  { %2614 = vmatpush1.bf16.msra.mxu0 %v2613_v38  ;;  %1472 = vmatprep.mubr.f32.mxu0 %v2845_v0 }
  0x67   :  { %2059 = vmatmul.mubr.f32.vlgmr.msra.gmra.mrb[4].mxu1 %v2941_v60  ;;  %2616 = vmatprep.subr.bf16.mxu0 %v2615_v49 }
  0x68   :  { %2662 = vmatpush1.bf16.msra.mxu1 %v2661_v28  ;;  %2064 = vmatprep.mubr.f32.mxu1 %v2845_v0 }
  0x69   :  { %1474 = vmatmul.mubr.f32.gmra.mrb[6].mxu0 %v2999_v44  ;;  %2664 = vmatprep.subr.bf16.mxu1 %v2663_v54 }
  0x6a   :  { %2618 = vmatpush1.bf16.msra.mxu0 %v2617_v2  ;;  %1560 = vmatprep.mubr.f32.mxu0 %v2845_v0 }
  0x6b   :  { %2066 = vmatmul.mubr.f32.gmra.mrb[6].mxu1 %v2999_v44  ;;  %2620 = vmatprep.subr.bf16.mxu0 %v3124_v10 }
  0x6c   :  { %2666 = vmatpush1.bf16.msra.mxu1 %v2665_v63  ;;  %2152 = vmatprep.mubr.f32.mxu1 %v2845_v0 }
  0x6d   :  { %1563 = vmatmul.mubr.f32.vlgmr.msra.gmra.mrb[4].mxu0 %v2958_v3  ;;  %2668 = vmatprep.subr.bf16.mxu1 %v3132_v62 }
  0x6e   :  { %2622 = vmatpush1.bf16.msra.mxu0 %v3139_v37  ;;  %1568 = vmatprep.mubr.f32.mxu0 %v2845_v0 }
  0x6f   :  { %2155 = vmatmul.mubr.f32.vlgmr.msra.gmra.mrb[4].mxu1 %v2958_v3  ;;  %2624 = vmatprep.subr.bf16.mxu0 %v3157_v13  ;;  %v2675_v3 = vpack.c.bf16 %v1967_v4, %v1955_v25  ;;  %v3435_v25 = vand.u32 4294901760, %v3155_v11  ;;  %v3439_v4 = vand.u32 4294901760, %v3186_v5 }
  0x70   :  { %2670 = vmatpush1.bf16.msra.mxu1 %v3146_v35  ;;  %2160 = vmatprep.mubr.f32.mxu1 %v2845_v0 }
  0x71   :  { %1571 = vmatmul.mubr.f32.gmra.mrb[6].mxu0 %v3007_v1  ;;  %2672 = vmatprep.subr.bf16.mxu1 %v3168_v19  ;;  %v2677_v30 = vpack.c.bf16 %v3435_v25, %v3434_v33  ;;  %v2633_v29 = vpack.c.bf16 %v3439_v4, %v3438_v22 }
  0x72   :  { %2626 = vmatpush1.bf16.msra.mxu0 %v3178_v20  ;;  %1649 = vmatprep.mubr.f32.mxu0 %v2845_v0 }
  0x73   :  { %2163 = vmatmul.mubr.f32.gmra.mrb[6].mxu1 %v3007_v1  ;;  %2628 = vmatprep.subr.bf16.mxu0 %v2627_v61  ;;  %v3436_v1 = vand.u32 4294901760, %v3170_v55 }
  0x74   :  { %2674 = vmatpush1.bf16.msra.mxu1 %v3274_v48  ;;  %2241 = vmatprep.mubr.f32.mxu1 %v2845_v0 }
  0x75   :  { %1653 = vmatmul.mubr.f32.vlgmr.msra.gmra.mrb[4].mxu0 %v2970_v12  ;;  %2676 = vmatprep.subr.bf16.mxu1 %v2675_v3  ;;  %v2679_v14 = vpack.c.bf16 %v3437_v34, %v3436_v1 }
  0x76   :  { %2630 = vmatpush1.bf16.msra.mxu0 %v2629_v58  ;;  %1658 = vmatprep.mubr.f32.mxu0 %v2845_v0 }
  0x77   :  { %2245 = vmatmul.mubr.f32.vlgmr.msra.gmra.mrb[4].mxu1 %v2970_v12  ;;  %2632 = vmatprep.subr.bf16.mxu0 %v2631_v8 }
  0x78   :  { %2678 = vmatpush1.bf16.msra.mxu1 %v2677_v30  ;;  %2250 = vmatprep.mubr.f32.mxu1 %v2845_v0 }
  0x79   :  { %1662 = vmatmul.mubr.f32.gmra.mrb[6].mxu0 %v3024_v16  ;;  %2680 = vmatprep.subr.bf16.mxu1 %v2679_v14 }
  0x7a   :  { %2634 = vmatpush1.bf16.msra.mxu0 %v2633_v29  ;;  %1756 = vmatprep.mubr.f32.mxu0 %v2845_v0 }
  0x7b   :  { %2254 = vmatmul.mubr.f32.gmra.mrb[6].mxu1 %v3024_v16  ;;  %2636 = vmatprep.subr.bf16.mxu0 %v3124_v10 }
  0x7c   :  { %2682 = vmatpush1.bf16.msra.mxu1 %v2681_v53  ;;  %2348 = vmatprep.mubr.f32.mxu1 %v2845_v0 }
  0x7d   :  { %1758 = vmatmul.mubr.f32.vlgmr.msra.gmra.mrb[4].mxu0 %v2941_v60  ;;  %2684 = vmatprep.subr.bf16.mxu1 %v3132_v62 }
  0x7e   :  { %2638 = vmatpush1.bf16.msra.mxu0 %v3139_v37  ;;  %1763 = vmatprep.mubr.f32.mxu0 %v2845_v0 }
  0x7f   :  { %2350 = vmatmul.mubr.f32.vlgmr.msra.gmra.mrb[4].mxu1 %v2941_v60  ;;  %2640 = vmatprep.subr.bf16.mxu0 %v3157_v13 }
  0x80   :  { %2686 = vmatpush1.bf16.msra.mxu1 %v3146_v35  ;;  %2355 = vmatprep.mubr.f32.mxu1 %v2845_v0 }
  0x81   :  { %1765 = vmatmul.mubr.f32.gmra.mrb[6].mxu0 %v2999_v44  ;;  %2688 = vmatprep.subr.bf16.mxu1 %v3168_v19 }
  0x82   :  { %2642 = vmatpush1.bf16.msra.mxu0 %v3178_v20  ;;  %1843 = vmatprep.mubr.f32.mxu0 %v2845_v0 }
  0x83   :  { %2357 = vmatmul.mubr.f32.gmra.mrb[6].mxu1 %v2999_v44 }
  0x84   :  { %2690 = vmatpush1.bf16.msra.mxu1 %v3274_v48  ;;  %2435 = vmatprep.mubr.f32.mxu1 %v2845_v0 }
  0x85   :  { %1845 = vmatmul.mubr.f32.vlgmr.msra.gmra.mrb[4].mxu0 %v2941_v60 }
  0x86   :  { %1850 = vmatprep.mubr.f32.mxu0 %v2845_v0 }
  0x87   :  { %2437 = vmatmul.mubr.f32.vlgmr.msra.gmra.mrb[4].mxu1 %v2941_v60 }
  0x88   :  { %2442 = vmatprep.mubr.f32.mxu1 %v2845_v0 }
  0x89   :  { %1852 = vmatmul.mubr.f32.gmra.mrb[6].mxu0 %v2999_v44 }
  0x8b   :  { %2444 = vmatmul.mubr.f32.gmra.mrb[6].mxu1 %v2999_v44 }
  0x9a   :  { %v68_v12 = vpop.permute.xlu0 %67 }
  0x9e   :  { %v73_v11 = vpop.permute.xlu0 %72 }
 0x128   :  { %v662_v16 = vpop.f32.mrb[0].mxu0 }
 0x129   :  { %v2691_v10 = vadd.f32 %v662_v16, %v68_v12  ;;  %v664_v62 = vpop.f32.mrb[1].mxu0 }
 0x12a   :  { %v1254_v37 = vpop.f32.mrb[0].mxu1  ;;  %v2692_v35 = vadd.f32 %v664_v62, %v68_v12 }
 0x12b   :  { %v2450_v13 = vmax.f32 %v2691_v10, 0.0  ;;  %v2695_v19 = vadd.f32 %v1254_v37, %v68_v12  ;;  %v1256_v55 = vpop.f32.mrb[1].mxu1 }
 0x12c   :  { %v2451_v17 = vmax.f32 %v2692_v35, 0.0  ;;  %v2696_v20 = vadd.f32 %v1256_v55, %v68_v12  ;;  %v669_v27 = vpop.f32.mrb[2].mxu0 }
 0x12d   :  { %2466 = vst [vmem:[#allocation5] sm:$0xff] %v2450_v13  ;;  %v2452_v60 = vmax.f32 %v2695_v19, 0.0  ;;  %v2693_v0 = vadd.f32 %v669_v27, %v73_v11  ;;  %v671_v5 = vpop.f32.mrb[3].mxu0 }
 0x12e   :  { %2467 = vst [vmem:[#allocation5 + $0x8] sm:$0xff] %v2451_v17  ;;  %v2453_v45 = vmax.f32 %v2696_v20, 0.0  ;;  %v1261_v44 = vpop.f32.mrb[2].mxu1  ;;  %v2694_v46 = vadd.f32 %v671_v5, %v73_v11 }
 0x12f   :  { %2468 = vst [vmem:[#allocation5 + $0x10] sm:$0xff] %v2452_v60  ;;  %v2458_v36 = vmax.f32 %v2693_v0, 0.0  ;;  %v2697_v40 = vadd.f32 %v1261_v44, %v73_v11  ;;  %v1263_v39 = vpop.f32.mrb[3].mxu1 }
 0x130   :  { %2469 = vst [vmem:[#allocation5 + $0x18] sm:$0xff] %v2453_v45  ;;  %v2459_v48 = vmax.f32 %v2694_v46, 0.0  ;;  %v2698_v47 = vadd.f32 %v1263_v39, %v73_v11 }
 0x131   :  { %2474 = vst [vmem:[#allocation5 + $0x40] sm:$0xff] %v2458_v36  ;;  %v2460_v50 = vmax.f32 %v2697_v40, 0.0 }
 0x132   :  { %2475 = vst [vmem:[#allocation5 + $0x48] sm:$0xff] %v2459_v48  ;;  %v2461_v43 = vmax.f32 %v2698_v47, 0.0 }
 0x133   :  { %2476 = vst [vmem:[#allocation5 + $0x50] sm:$0xff] %v2460_v50 }
 0x134   :  { %2477 = vst [vmem:[#allocation5 + $0x58] sm:$0xff] %v2461_v43 }
 0x158   :  { %v1846_v52 = vpop.f32.mrb[4].mxu0 }
 0x159   :  { %v2699_v56 = vadd.f32 %v1846_v52, %v68_v12  ;;  %v1848_v23 = vpop.f32.mrb[5].mxu0 }
 0x15a   :  { %v2438_v7 = vpop.f32.mrb[4].mxu1  ;;  %v2700_v57 = vadd.f32 %v1848_v23, %v68_v12 }
 0x15b   :  { %v2454_v59 = vmax.f32 %v2699_v56, 0.0  ;;  %v2703_v31 = vadd.f32 %v2438_v7, %v68_v12  ;;  %v2440_v32 = vpop.f32.mrb[5].mxu1 }
 0x15c   :  { %v2455_v15 = vmax.f32 %v2700_v57, 0.0  ;;  %v2704_v26 = vadd.f32 %v2440_v32, %v68_v12  ;;  %v1853_v42 = vpop.f32.mrb[6].mxu0 }
 0x15d   :  { %2470 = vst [vmem:[#allocation5 + $0x20] sm:$0xff] %v2454_v59  ;;  %v2456_v24 = vmax.f32 %v2703_v31, 0.0  ;;  %v2701_v41 = vadd.f32 %v1853_v42, %v73_v11  ;;  %v1855_v6 = vpop.f32.mrb[7].mxu0 }
 0x15e   :  { %2471 = vst [vmem:[#allocation5 + $0x28] sm:$0xff] %v2455_v15  ;;  %v2457_v9 = vmax.f32 %v2704_v26, 0.0  ;;  %v2445_v38 = vpop.f32.mrb[6].mxu1  ;;  %v2702_v49 = vadd.f32 %v1855_v6, %v73_v11 }
 0x15f   :  { %2472 = vst [vmem:[#allocation5 + $0x30] sm:$0xff] %v2456_v24  ;;  %v2462_v28 = vmax.f32 %v2701_v41, 0.0  ;;  %v2705_v54 = vadd.f32 %v2445_v38, %v73_v11  ;;  %v2447_v2 = vpop.f32.mrb[7].mxu1 }
 0x160   :  { %2473 = vst [vmem:[#allocation5 + $0x38] sm:$0xff] %v2457_v9  ;;  %v2463_v63 = vmax.f32 %v2702_v49, 0.0  ;;  %v2706_v61 = vadd.f32 %v2447_v2, %v73_v11 }
 0x161   :  { %2478 = vst [vmem:[#allocation5 + $0x60] sm:$0xff] %v2462_v28  ;;  %v2464_v3 = vmax.f32 %v2705_v54, 0.0 }
 0x162   :  { %2479 = vst [vmem:[#allocation5 + $0x68] sm:$0xff] %v2463_v63  ;;  %v2465_v51 = vmax.f32 %v2706_v61, 0.0 }
 0x163   :  { %2480 = vst [vmem:[#allocation5 + $0x70] sm:$0xff] %v2464_v3 }
 0x164   :  { %2481 = vst [vmem:[#allocation5 + $0x78] sm:$0xff] %v2465_v51 }
 0x165   :  { %2827 = shalt.err (!%p2824_p12)
}
 0x166   :  { %s2828_s9 = scalar_lea.hbm %s3419_s3, 2048 }
 0x167   :  { %p2829_p13 = scmp.ne.s32.totalorder %s3419_s3, %s2828_s9  ;;  %p2832_p0 = scmp.lt.u32.totalorder %s2828_s9, %s3419_s3 }
 0x169   :  { %p2834_p1 = pnand %p2832_p0, %p2829_p13 }
 0x16b   :  { %2837 = shalt.err (!%p2834_p1)
}
 0x16c   :  { %2493 = dma.vmem_to_hbm [thread:$0]  %s2488_s2, 2048, %s3419_s3, [#allocation4], %s2843_s22, %s2843_s22, %s2844_s23  }
 0x16d   :  { %2840 = dma.done.wait [#allocation4], 2048  }
 0x16e   :  { %2841 = vsyncadd [#allocation4], 4294965248 }
 0x16f   :  { %2497 = vsyncpa [#allocation3], 1 }
 0x170   :  { %2498 = vsyncpa [#allocation4], 1 }

</bundles_post_ra>
